<compile_context>
chip_gen: v6e
topology: v6e:2x2x1
jax: 0.10.0
libtpu: 0.0.40
codegen_flags: <defaults>
</compile_context>

<pallas_src>
import jax
import jax.numpy as jnp
from jax.experimental import pallas as pl
from jax.experimental.pallas import tpu as pltpu


def _round_up(x: int, m: int) -> int:
    return ((x + m - 1) // m) * m


def _pad2(a, rows, cols, dtype):
    a = jnp.pad(a, ((0, rows - a.shape[0]), (0, cols - a.shape[1])))
    return a.astype(dtype)


def _mlp_kernel(x_ref, w1_ref, b1_ref, w2_ref, b2_ref, o_ref):
    # Layer 1: x @ W1 (bf16 -> MXU, f32 accumulate); bias add + ReLU in f32 (VPU).
    h = jnp.dot(x_ref[...], w1_ref[...], preferred_element_type=jnp.float32)
    h = jnp.maximum(h + b1_ref[...], 0.0)
    # Layer 2: h @ W2 (cast activations back to the MXU compute dtype).
    o = jnp.dot(h.astype(w2_ref.dtype), w2_ref[...],
                preferred_element_type=jnp.float32)
    o_ref[...] = (o + b2_ref[...]).astype(o_ref.dtype)


def prepare_mlp_params(w1, b1, w2, b2, *, compute_dtype=jnp.bfloat16):
    """One-time, wrap-time pad + cast of module parameters to MXU geometry.

    Doing this once (instead of per forward call) removes a full HBM read+write
    pass over every parameter from the per-call cost.
    """
    f_in, hid = w1.shape
    hid2, f_out = w2.shape
    assert hid == hid2 and b1.size == hid and b2.size == f_out
    f_in_p = _round_up(f_in, 128)
    hid_p = _round_up(hid, 128)
    f_out_p = _round_up(f_out, 128)     # lane-dense output slab
    return dict(
        w1=_pad2(w1, f_in_p, hid_p, compute_dtype),
        b1=_pad2(b1.reshape(1, -1), 1, hid_p, jnp.float32),
        w2=_pad2(w2, hid_p, f_out_p, compute_dtype),
        b2=_pad2(b2.reshape(1, -1), 1, f_out_p, jnp.float32),
        f_in=f_in, hid=hid, f_out=f_out,
        f_in_p=f_in_p, hid_p=hid_p, f_out_p=f_out_p,
        compute_dtype=compute_dtype,
    )


def module_wrapper_forward(x, params, *, tm: int = 512, out_dtype=None):
    """Pallas equivalent of ModuleWrapper.forward(inputs) for the prepared MLP.

    x : (N, F_in); params : output of prepare_mlp_params(); returns (N, F_out).
    """
    compute_dtype = params["compute_dtype"]
    out_dtype = compute_dtype if out_dtype is None else out_dtype
    n, f_in = x.shape
    assert f_in == params["f_in"]
    f_in_p, hid_p, f_out_p = params["f_in_p"], params["hid_p"], params["f_out_p"]
    f_out = params["f_out"]

    # ---- batch tiling: multiples of 16 (bf16 packs 16 sublanes per vreg); big
    # tiles (up to 512) amortize the ~0.35us per-grid-step overhead.  Pick the
    # largest candidate tile that divides the padded batch.
    n_p = _round_up(n, 128) if n > 128 else _round_up(n, 16)
    tm_sel = 16
    for cand in (512, 256, 128, 64, 32, 16):
        if cand <= max(tm, 16) and n_p % cand == 0:
            tm_sel = cand
            break
    tm = tm_sel
    ni = n_p // tm

    # ---- pad / cast x only when actually needed (trace-time static decision).
    x_p = x
    if (n_p, f_in_p) != (n, f_in):
        x_p = jnp.pad(x_p, ((0, n_p - n), (0, f_in_p - f_in)))
    if x_p.dtype != compute_dtype:
        x_p = x_p.astype(compute_dtype)

    # ---- optional second "parallel" axis over f_out tiles so both v7x
    # TensorCores get work when the batch axis has only a single tile.
    # (Layer-1 recompute per j tile is acceptable because this only triggers
    # with a single batch tile.)
    if ni < 2 and f_out_p % 256 == 0:
        tn = f_out_p // 2
    else:
        tn = f_out_p
    nj = f_out_p // tn

    # ---- VMEM budget: resident weights (single-buffered) + streamed x/out
    # tiles + f32 intermediates; leave >=16 MiB headroom below physical VMEM
    # (64 MiB/TC on v7x, 128 MiB on v5e/v6e).
    csz = jnp.dtype(compute_dtype).itemsize
    osz = jnp.dtype(out_dtype).itemsize
    resident = (f_in_p * hid_p + hid_p * f_out_p) * csz + (hid_p + f_out_p) * 4
    streamed = 3 * tm * f_in_p * csz + 2 * tm * tn * osz
    need = resident + streamed + tm * hid_p * 4 + tm * tn * 4
    try:
        vmem_cap = int(getattr(pltpu.get_tpu_info(), "vmem_capacity_bytes",
                               64 * 1024 * 1024))
    except Exception:
        vmem_cap = 64 * 1024 * 1024
    vmem_limit = int(min(vmem_cap - (16 << 20), max(2 * need + (4 << 20), 32 << 20)))
    vmem_limit = max(vmem_limit, 16 << 20)

    cost = pl.CostEstimate(
        flops=2 * n_p * (nj * f_in_p * hid_p + hid_p * f_out_p),
        transcendentals=0,
        bytes_accessed=(n_p * f_in_p * csz
                        + (f_in_p * hid_p + hid_p * f_out_p) * csz
                        + (hid_p + f_out_p) * 4
                        + n_p * f_out_p * osz),
    )

    def make_specs(pipelined):
        def resident_spec(shape, imap):
            # Constant-index blocks: one VMEM buffer is enough (no re-DMA).
            if pipelined:
                return pl.BlockSpec(shape, imap, pipeline_mode=pl.Buffered(1))
            return pl.BlockSpec(shape, imap)

        def x_spec():
            # Deeper pipelining on the streamed x tiles hides DMA latency when
            # the per-tile MXU burst is short (small hid/f_out).
            if pipelined and ni >= 3:
                return pl.BlockSpec((tm, f_in_p), lambda i, j: (i, 0),
                                    pipeline_mode=pl.Buffered(3))
            return pl.BlockSpec((tm, f_in_p), lambda i, j: (i, 0))

        if nj == 1:
            w2_spec = resident_spec((hid_p, tn), lambda i, j: (0, j))
            b2_spec = resident_spec((1, tn), lambda i, j: (0, j))
        else:  # streamed over j -> keep default double buffering
            w2_spec = pl.BlockSpec((hid_p, tn), lambda i, j: (0, j))
            b2_spec = pl.BlockSpec((1, tn), lambda i, j: (0, j))

        in_specs = [
            x_spec(),
            resident_spec((f_in_p, hid_p), lambda i, j: (0, 0)),
            resident_spec((1, hid_p), lambda i, j: (0, 0)),
            w2_spec,
            b2_spec,
        ]
        out_spec = pl.BlockSpec((tm, tn), lambda i, j: (i, j))
        return in_specs, out_spec

    def build(pipelined):
        in_specs, out_spec = make_specs(pipelined)
        return pl.pallas_call(
            _mlp_kernel,
            out_shape=jax.ShapeDtypeStruct((n_p, f_out_p), out_dtype),
            grid_spec=pltpu.PrefetchScalarGridSpec(
                num_scalar_prefetch=0,
                grid=(ni, nj),
                in_specs=in_specs,
                out_specs=out_spec,
            ),
            compiler_params=pltpu.CompilerParams(
                dimension_semantics=("parallel", "parallel"),
                vmem_limit_bytes=vmem_limit,
            ),
            cost_estimate=cost,
        )

    args = (x_p, params["w1"], params["b1"], params["w2"], params["b2"])
    try:
        out_p = build(True)(*args)
    except Exception:
        # Fallback: default double-buffered pipelining if this jax/Mosaic
        # version rejects pipeline_mode=pl.Buffered(...).
        out_p = build(False)(*args)

    # Padded batch rows / f_out lanes contain relu(b1)@W2+b2 garbage; they must
    # be sliced away (skip the slice entirely when no padding was added).
    if (n_p, f_out_p) == (n, f_out):
        return out_p
    return out_p[:n, :f_out]


if __name__ == "__main__":
    # Small logical shapes consistent with a generic multi-layer module wrapper;
    # parameters are padded/cast once at wrap time, activations per call.
    N, F_IN, HID, F_OUT = 8, 32, 64, 16

    key = jax.random.PRNGKey(0)
    kx, kw1, kb1, kw2, kb2 = jax.random.split(key, 5)

    x = jax.random.normal(kx, (N, F_IN), dtype=jnp.float32)
    w1 = jax.random.normal(kw1, (F_IN, HID), dtype=jnp.float32) * 0.1
    b1 = jax.random.normal(kb1, (1, HID), dtype=jnp.float32) * 0.01
    w2 = jax.random.normal(kw2, (HID, F_OUT), dtype=jnp.float32) * 0.1
    b2 = jax.random.normal(kb2, (1, F_OUT), dtype=jnp.float32) * 0.01

    # One-time wrap-time parameter preparation, then the per-call forward.
    params = prepare_mlp_params(w1, b1, w2, b2)
    out = module_wrapper_forward(x, params)
    out = jax.block_until_ready(out)
    assert out.shape == (N, F_OUT), out.shape
    assert out.dtype == jnp.bfloat16, out.dtype

    # Reference emulating the kernel numerics: bf16 operands into the MXU,
    # f32 accumulate, bf16 output.
    def bf(a):
        return a.astype(jnp.bfloat16).astype(jnp.float32)

    h_ref = jnp.maximum(bf(x) @ bf(w1) + b1, 0.0)
    ref = (bf(h_ref) @ bf(w2) + b2).astype(jnp.bfloat16).astype(jnp.float32)
    out_f32 = out.astype(jnp.float32)
    assert jnp.allclose(out_f32, ref, atol=2e-2, rtol=2e-2), (
        float(jnp.max(jnp.abs(out_f32 - ref))))

    # Looser sanity check against the pure-f32 forward (bf16 rounding of
    # operands + bf16 output).
    ref_f32 = jnp.maximum(x @ w1 + b1, 0.0) @ w2 + b2
    assert jnp.allclose(out_f32, ref_f32, atol=5e-2, rtol=5e-2)

    print("KERNEL_OK")
</pallas_src>

<mosaic_0001>
module attributes {stable_mosaic.version = 11 : i64} {
  func.func @_mlp_kernel(%arg0: i32, %arg1: i32, %arg2: memref<16x128xbf16, #tpu.memory_space<vmem>>, %arg3: memref<128x128xbf16, #tpu.memory_space<vmem>>, %arg4: memref<1x128xf32, #tpu.memory_space<vmem>>, %arg5: memref<128x128xbf16, #tpu.memory_space<vmem>>, %arg6: memref<1x128xf32, #tpu.memory_space<vmem>>, %arg7: memref<16x128xbf16, #tpu.memory_space<vmem>>) attributes {dimension_semantics = [#tpu.dimension_semantics<parallel>, #tpu.dimension_semantics<parallel>], iteration_bounds = array<i64: 1, 1>, scalar_prefetch = 0 : i64, scratch_operands = 0 : i64, tpu.core_type = #tpu.core_type<tc>, window_params = [{transform_indices = @transform_0, window_bounds = array<i64: 16, 128>}, {pipeline_mode = #tpu.pipeline_mode<synchronous>, transform_indices = @transform_1, window_bounds = array<i64: 128, 128>}, {pipeline_mode = #tpu.pipeline_mode<synchronous>, transform_indices = @transform_2, window_bounds = array<i64: 1, 128>}, {pipeline_mode = #tpu.pipeline_mode<synchronous>, transform_indices = @transform_3, window_bounds = array<i64: 128, 128>}, {pipeline_mode = #tpu.pipeline_mode<synchronous>, transform_indices = @transform_4, window_bounds = array<i64: 1, 128>}, {transform_indices = @transform_5, window_bounds = array<i64: 16, 128>}]} {
    %c0 = arith.constant 0 : index
    %c0_0 = arith.constant 0 : index
    %0 = vector.load %arg2[%c0, %c0_0] : memref<16x128xbf16, #tpu.memory_space<vmem>>, vector<16x128xbf16>
    %c0_1 = arith.constant 0 : index
    %c0_2 = arith.constant 0 : index
    %1 = vector.load %arg3[%c0_1, %c0_2] : memref<128x128xbf16, #tpu.memory_space<vmem>>, vector<128x128xbf16>
    %cst = arith.constant dense<0.000000e+00> : vector<16x128xf32>
    %2 = tpu.matmul %0, %1, %cst {dimension_numbers = #tpu.dot_dimension_numbers<[1], [0], [0], [1], [0, 0, 1, 1], [], []>} : vector<16x128xbf16>, vector<128x128xbf16>, vector<16x128xf32> -> vector<16x128xf32>
    %c0_3 = arith.constant 0 : index
    %c0_4 = arith.constant 0 : index
    %3 = vector.load %arg4[%c0_3, %c0_4] : memref<1x128xf32, #tpu.memory_space<vmem>>, vector<1x128xf32>
    %4 = vector.broadcast %3 : vector<1x128xf32> to vector<16x128xf32>
    %5 = arith.addf %2, %4 : vector<16x128xf32>
    %cst_5 = arith.constant 0.000000e+00 : f32
    %6 = vector.broadcast %cst_5 : f32 to vector<16x128xf32>
    %7 = arith.maximumf %5, %6 : vector<16x128xf32>
    %8 = arith.truncf %7 : vector<16x128xf32> to vector<16x128xbf16>
    %c0_6 = arith.constant 0 : index
    %c0_7 = arith.constant 0 : index
    %9 = vector.load %arg5[%c0_6, %c0_7] : memref<128x128xbf16, #tpu.memory_space<vmem>>, vector<128x128xbf16>
    %cst_8 = arith.constant dense<0.000000e+00> : vector<16x128xf32>
    %10 = tpu.matmul %8, %9, %cst_8 {dimension_numbers = #tpu.dot_dimension_numbers<[1], [0], [0], [1], [0, 0, 1, 1], [], []>} : vector<16x128xbf16>, vector<128x128xbf16>, vector<16x128xf32> -> vector<16x128xf32>
    %c0_9 = arith.constant 0 : index
    %c0_10 = arith.constant 0 : index
    %11 = vector.load %arg6[%c0_9, %c0_10] : memref<1x128xf32, #tpu.memory_space<vmem>>, vector<1x128xf32>
    %12 = vector.broadcast %11 : vector<1x128xf32> to vector<16x128xf32>
    %13 = arith.addf %10, %12 : vector<16x128xf32>
    %14 = arith.truncf %13 : vector<16x128xf32> to vector<16x128xbf16>
    %c0_11 = arith.constant 0 : index
    %c0_12 = arith.constant 0 : index
    %15 = vector.load %arg7[%c0_11, %c0_12] : memref<16x128xbf16, #tpu.memory_space<vmem>>, vector<16x128xbf16>
    tpu.vector_store %arg7[%c0_11, %c0_12], %14 {strides = array<i32>} : memref<16x128xbf16, #tpu.memory_space<vmem>>, vector<16x128xbf16>,
    return
  }
  func.func @transform_0(%arg0: i32, %arg1: i32) -> (i32, i32) {
    %c0_i32 = arith.constant 0 : i32
    %c0_i32_0 = arith.constant 0 : i32
    return %arg0, %c0_i32 : i32, i32
  }
  func.func @transform_1(%arg0: i32, %arg1: i32) -> (i32, i32) {
    %c0_i32 = arith.constant 0 : i32
    %c0_i32_0 = arith.constant 0 : i32
    %c0_i32_1 = arith.constant 0 : i32
    return %c0_i32, %c0_i32_0 : i32, i32
  }
  func.func @transform_2(%arg0: i32, %arg1: i32) -> (i32, i32) {
    %c0_i32 = arith.constant 0 : i32
    %c0_i32_0 = arith.constant 0 : i32
    %c0_i32_1 = arith.constant 0 : i32
    return %c0_i32, %c0_i32_0 : i32, i32
  }
  func.func @transform_3(%arg0: i32, %arg1: i32) -> (i32, i32) {
    %c0_i32 = arith.constant 0 : i32
    %c0_i32_0 = arith.constant 0 : i32
    return %c0_i32, %arg1 : i32, i32
  }
  func.func @transform_4(%arg0: i32, %arg1: i32) -> (i32, i32) {
    %c0_i32 = arith.constant 0 : i32
    %c0_i32_0 = arith.constant 0 : i32
    return %c0_i32, %arg1 : i32, i32
  }
  func.func @transform_5(%arg0: i32, %arg1: i32) -> (i32, i32) {
    %c0_i32 = arith.constant 0 : i32
    return %arg0, %arg1 : i32, i32
  }
}

module attributes {stable_mosaic.version = 11 : i64} {
  func.func @_mlp_kernel(%arg0: i32, %arg1: i32, %arg2: memref<16x128xbf16, #tpu.memory_space<vmem>>, %arg3: memref<128x128xbf16, #tpu.memory_space<vmem>>, %arg4: memref<1x128xf32, #tpu.memory_space<vmem>>, %arg5: memref<128x128xbf16, #tpu.memory_space<vmem>>, %arg6: memref<1x128xf32, #tpu.memory_space<vmem>>, %arg7: memref<16x128xbf16, #tpu.memory_space<vmem>>) attributes {dimension_semantics = [#tpu.dimension_semantics<parallel>, #tpu.dimension_semantics<parallel>], iteration_bounds = array<i64: 1, 1>, scalar_prefetch = 0 : i64, scratch_operands = 0 : i64, tpu.core_type = #tpu.core_type<tc>, window_params = [{transform_indices = @transform_0, window_bounds = array<i64: 16, 128>}, {pipeline_mode = #tpu.pipeline_mode<synchronous>, transform_indices = @transform_1, window_bounds = array<i64: 128, 128>}, {pipeline_mode = #tpu.pipeline_mode<synchronous>, transform_indices = @transform_2, window_bounds = array<i64: 1, 128>}, {transform_indices = @transform_3, window_bounds = array<i64: 128, 128>}, {transform_indices = @transform_4, window_bounds = array<i64: 1, 128>}, {transform_indices = @transform_5, window_bounds = array<i64: 16, 128>}]} {
    %c0 = arith.constant 0 : index
    %c0_0 = arith.constant 0 : index
    %0 = vector.load %arg2[%c0, %c0_0] : memref<16x128xbf16, #tpu.memory_space<vmem>>, vector<16x128xbf16>
    %c0_1 = arith.constant 0 : index
    %c0_2 = arith.constant 0 : index
    %1 = vector.load %arg3[%c0_1, %c0_2] : memref<128x128xbf16, #tpu.memory_space<vmem>>, vector<128x128xbf16>
    %cst = arith.constant dense<0.000000e+00> : vector<16x128xf32>
    %2 = tpu.matmul %0, %1, %cst {dimension_numbers = #tpu.dot_dimension_numbers<[1], [0], [0], [1], [0, 0, 1, 1], [], []>} : vector<16x128xbf16>, vector<128x128xbf16>, vector<16x128xf32> -> vector<16x128xf32>
    %c0_3 = arith.constant 0 : index
    %c0_4 = arith.constant 0 : index
    %3 = vector.load %arg4[%c0_3, %c0_4] : memref<1x128xf32, #tpu.memory_space<vmem>>, vector<1x128xf32>
    %4 = vector.broadcast %3 : vector<1x128xf32> to vector<16x128xf32>
    %5 = arith.addf %2, %4 : vector<16x128xf32>
    %cst_5 = arith.constant 0.000000e+00 : f32
    %6 = vector.broadcast %cst_5 : f32 to vector<16x128xf32>
    %7 = arith.maximumf %5, %6 : vector<16x128xf32>
    %8 = arith.truncf %7 : vector<16x128xf32> to vector<16x128xbf16>
    %c0_6 = arith.constant 0 : index
    %c0_7 = arith.constant 0 : index
    %9 = vector.load %arg5[%c0_6, %c0_7] : memref<128x128xbf16, #tpu.memory_space<vmem>>, vector<128x128xbf16>
    %cst_8 = arith.constant dense<0.000000e+00> : vector<16x128xf32>
    %10 = tpu.matmul %8, %9, %cst_8 {dimension_numbers = #tpu.dot_dimension_numbers<[1], [0], [0], [1], [0, 0, 1, 1], [], []>} : vector<16x128xbf16>, vector<128x128xbf16>, vector<16x128xf32> -> vector<16x128xf32>
    %c0_9 = arith.constant 0 : index
    %c0_10 = arith.constant 0 : index
    %11 = vector.load %arg6[%c0_9, %c0_10] : memref<1x128xf32, #tpu.memory_space<vmem>>, vector<1x128xf32>
    %12 = vector.broadcast %11 : vector<1x128xf32> to vector<16x128xf32>
    %13 = arith.addf %10, %12 : vector<16x128xf32>
    %14 = arith.truncf %13 : vector<16x128xf32> to vector<16x128xbf16>
    %c0_11 = arith.constant 0 : index
    %c0_12 = arith.constant 0 : index
    %15 = vector.load %arg7[%c0_11, %c0_12] : memref<16x128xbf16, #tpu.memory_space<vmem>>, vector<16x128xbf16>
    tpu.vector_store %arg7[%c0_11, %c0_12], %14 {strides = array<i32>} : memref<16x128xbf16, #tpu.memory_space<vmem>>, vector<16x128xbf16>,
    return
  }
  func.func @transform_0(%arg0: i32, %arg1: i32) -> (i32, i32) {
    %c0_i32 = arith.constant 0 : i32
    %c0_i32_0 = arith.constant 0 : i32
    return %arg0, %c0_i32 : i32, i32
  }
  func.func @transform_1(%arg0: i32, %arg1: i32) -> (i32, i32) {
    %c0_i32 = arith.constant 0 : i32
    %c0_i32_0 = arith.constant 0 : i32
    %c0_i32_1 = arith.constant 0 : i32
    return %c0_i32, %c0_i32_0 : i32, i32
  }
  func.func @transform_2(%arg0: i32, %arg1: i32) -> (i32, i32) {
    %c0_i32 = arith.constant 0 : i32
    %c0_i32_0 = arith.constant 0 : i32
    %c0_i32_1 = arith.constant 0 : i32
    return %c0_i32, %c0_i32_0 : i32, i32
  }
  func.func @transform_3(%arg0: i32, %arg1: i32) -> (i32, i32) {
    %c0_i32 = arith.constant 0 : i32
    %c0_i32_0 = arith.constant 0 : i32
    return %c0_i32, %arg1 : i32, i32
  }
  func.func @transform_4(%arg0: i32, %arg1: i32) -> (i32, i32) {
    %c0_i32 = arith.constant 0 : i32
    %c0_i32_0 = arith.constant 0 : i32
    return %c0_i32, %arg1 : i32, i32
  }
  func.func @transform_5(%arg0: i32, %arg1: i32) -> (i32, i32) {
    %c0_i32 = arith.constant 0 : i32
    return %arg0, %arg1 : i32, i32
  }
}

</mosaic_0001>

<bundles_post_ra>
// kernel: tpu_custom_call.1
= control target key start
LH: loop header
LB: loop body
LE: loop exit
PB: predicated region body
PF: predicated region fallthrough
CT: control target
= control target key end

     0   :  { %10 = vsyncpa [#allocation3], 0  ;;  %s591_s0 = inlined_call_operand.hbm [shape: bf16[16,128], index: 0, kind: input, shape index: {}]   ;;  %s592_s1 = inlined_call_operand.hbm [shape: bf16[128,128], index: 1, kind: input, shape index: {}]   ;;  %s593_s2 = inlined_call_operand.vmem [shape: f32[1,128], index: 2, kind: input, shape index: {}]   ;;  %s594_s3 = inlined_call_operand.hbm [shape: bf16[128,128], index: 3, kind: input, shape index: {}]   ;;  %s595_s4 = inlined_call_operand.vmem [shape: f32[1,128], index: 4, kind: input, shape index: {}]   ;;  %s596_s5 = inlined_call_operand.hbm [shape: bf16[16,128], index: 5, kind: output, shape index: {}]  }
   0x1   :  { %11 = vsyncpa [#allocation6], 0 }
   0x2   :  { %12 = vsyncpa [#allocation4], 0  ;;  %s523_s18 = smov [#allocation5]   ;;  %s524_s20 = smov [#allocation2]  }
   0x3   :  { %s30_s19 = sshll.u32 %s523_s18, 4  ;;  %s18_s21 = sshll.u32 %s524_s20, 4  ;;  %s31_s19 = int_to_ptr.vmem [resolvable:$true] %s30_s19  ;;  %s19_s21 = int_to_ptr.vmem [resolvable:$true] %s18_s21 }
   0x4   :  { %s445_s22 = scalar_lea.vmem %s31_s19, 1024  ;;  %p450_p1 = scmp.lt.s32.totalorder %s31_s19, %s31_s19 }
   0x5   :  { %p446_p0 = scmp.ne.s32.totalorder %s31_s19, %s445_s22  ;;  %p451_p2 = scmp.lt.s32.totalorder %s445_s22, %s445_s22 }
   0x7   :  { %p452_p3 = por %p451_p2, %p450_p1 }
   0x9   :  { %p453_p4 = pnand %p452_p3, %p446_p0 }
   0xb   :  { %456 = shalt.err (!%p453_p4)
}
   0xc   :  { %s525_s23 = smov 64   ;;  %s526_s24 = smov 4  }
   0xd   :  { %36 = dma.hbm_to_vmem [thread:$0]  %s592_s1, 1024, %s31_s19, [#allocation6], %s525_s23, %s525_s23, %s526_s24  }
   0xe   :  { %s465_s27 = scalar_lea.vmem %s19_s21, 128  ;;  %p470_p6 = scmp.lt.s32.totalorder %s19_s21, %s19_s21 }
   0xf   :  { %p466_p5 = scmp.ne.s32.totalorder %s19_s21, %s465_s27  ;;  %p471_p7 = scmp.lt.s32.totalorder %s465_s27, %s465_s27 }
  0x11   :  { %p472_p8 = por %p471_p7, %p470_p6 }
  0x13   :  { %p473_p9 = pnand %p472_p8, %p466_p5 }
  0x15   :  { %476 = shalt.err (!%p473_p9)
}
  0x16   :  { %24 = dma.hbm_to_vmem [thread:$0]  %s591_s0, 128, %s19_s21, [#allocation3], %s525_s23, %s525_s23, %s526_s24  }
  0x17   :  { %s527_s30 = smov [#allocation7]  }
  0x18   :  { %s44_s6 = sshll.u32 %s527_s30, 4  ;;  %s45_s6 = int_to_ptr.vmem [resolvable:$true] %s44_s6 }
  0x19   :  { %s485_s7 = scalar_lea.vmem %s45_s6, 1024  ;;  %p490_p11 = scmp.lt.s32.totalorder %s45_s6, %s45_s6 }
  0x1a   :  { %p486_p10 = scmp.ne.s32.totalorder %s45_s6, %s485_s7  ;;  %p491_p12 = scmp.lt.s32.totalorder %s485_s7, %s485_s7 }
  0x1c   :  { %p492_p13 = por %p491_p12, %p490_p11 }
  0x1e   :  { %p493_p0 = pnand %p492_p13, %p486_p10 }
  0x20   :  { %496 = shalt.err (!%p493_p0)
}
  0x21   :  { %50 = dma.hbm_to_vmem [thread:$0]  %s594_s3, 1024, %s45_s6, [#allocation6], %s525_s23, %s525_s23, %s526_s24  }
  0x22   :  { %517 = dma.done.wait [#allocation3], 128  }
  0x23   :  { %518 = vsyncadd [#allocation3], 4294967168 }
  0x24   :  { %519 = dma.done.wait [#allocation6], 2048  }
  0x25   :  { %520 = vsyncadd [#allocation6], 4294965248  ;;  %v528_v0 = vmov 0.0   ;;  %vm529_vm0 = vmmov 0   ;;  %v420_v1 = vld [vmem:[#allocation5 + $0x38] sm:$0xff]   ;;  %v421_v2 = vld [vmem:[#allocation5 + $0x30] sm:$0xff]  }
  0x26   :  { %372 = vmatprep.subr.bf16.mxu0 %v528_v0  ;;  %388 = vmatprep.mubr.msk.bf16.mxu0 %vm529_vm0, %v528_v0  ;;  %v422_v3 = vld [vmem:[#allocation5 + $0x28] sm:$0xff]   ;;  %v429_v4 = vld [vmem:[#allocation7 + $0x38] sm:$0xff]   ;;  %v423_v5 = vld [vmem:[#allocation5 + $0x20] sm:$0xff]   ;;  %s530_s11 = smov [#allocation8]  }
  0x27   :  { %392 = vmatprep.subr.bf16.mxu1 %v528_v0  ;;  %408 = vmatprep.mubr.msk.bf16.mxu1 %vm529_vm0, %v528_v0  ;;  %v430_v6 = vld [vmem:[#allocation7 + $0x30] sm:$0xff]   ;;  %v424_v7 = vld [vmem:[#allocation5 + $0x18] sm:$0xff]   ;;  %v431_v8 = vld [vmem:[#allocation7 + $0x28] sm:$0xff]   ;;  %s313_s12 = sshll.u32 %s530_s11, 4  ;;  %s314_s12 = int_to_ptr.vmem [resolvable:$true] %s313_s12 }
  0x28   :  { %373 = vmatpush3.bf16.msra.mxu0 %v420_v1  ;;  %393 = vmatpush3.bf16.msra.mxu1 %v429_v4  ;;  %v425_v9 = vld [vmem:[#allocation5 + $0x10] sm:$0xff]   ;;  %v432_v10 = vld [vmem:[#allocation7 + $0x20] sm:$0xff]   ;;  %v426_v11 = vld [vmem:[#allocation5 + $0x8] sm:$0xff]   ;;  %p502_p2 = scmp.lt.s32.totalorder %s314_s12, %s314_s12 }
  0x29   :  { %374 = vmatprep.subr.bf16.mxu0 %v528_v0  ;;  %394 = vmatprep.subr.bf16.mxu1 %v528_v0  ;;  %v433_v12 = vld [vmem:[#allocation7 + $0x18] sm:$0xff]   ;;  %v427_v13 = vld [vmem:[#allocation5] sm:$0xff]   ;;  %v434_v15 = vld [vmem:[#allocation7 + $0x10] sm:$0xff]  }
  0x2a   :  { %v428_v14 = vld [vmem:[#allocation2] sm:$0xff]   ;;  %v435_v16 = vld [vmem:[#allocation7 + $0x8] sm:$0xff]   ;;  %v436_v17 = vld [vmem:[#allocation7] sm:$0xff]  }
  0x2b   :  { %v326_v18 = vld [vmem:[%s593_s2] ss:$0 sm:$0xff]  ;;  %s497_s2 = scalar_lea.vmem %s314_s12, 128 }
  0x2c   :  { %375 = vmatpush3.bf16.msra.mxu0 %v421_v2  ;;  %395 = vmatpush3.bf16.msra.mxu1 %v430_v6  ;;  %v336_v29 = vld [vmem:[%s595_s4] ss:$0 sm:$0xff]  ;;  %p498_p1 = scmp.ne.s32.totalorder %s314_s12, %s497_s2  ;;  %p503_p3 = scmp.lt.s32.totalorder %s497_s2, %s497_s2 }
  0x2d   :  { %376 = vmatprep.subr.bf16.mxu0 %v528_v0  ;;  %396 = vmatprep.subr.bf16.mxu1 %v528_v0 }
  0x2e   :  { %p504_p4 = por %p503_p3, %p502_p2 }
  0x30   :  { %377 = vmatpush3.bf16.msra.mxu0 %v422_v3  ;;  %397 = vmatpush3.bf16.msra.mxu1 %v431_v8  ;;  %p505_p5 = pnand %p504_p4, %p498_p1 }
  0x31   :  { %378 = vmatprep.subr.bf16.mxu0 %v528_v0  ;;  %398 = vmatprep.subr.bf16.mxu1 %v528_v0 }
  0x34   :  { %379 = vmatpush3.bf16.msra.mxu0 %v423_v5  ;;  %399 = vmatpush3.bf16.msra.mxu1 %v432_v10 }
  0x35   :  { %380 = vmatprep.subr.bf16.mxu0 %v528_v0  ;;  %400 = vmatprep.subr.bf16.mxu1 %v528_v0 }
  0x38   :  { %381 = vmatpush3.bf16.msra.mxu0 %v424_v7  ;;  %401 = vmatpush3.bf16.msra.mxu1 %v433_v12 }
  0x39   :  { %382 = vmatprep.subr.bf16.mxu0 %v528_v0  ;;  %402 = vmatprep.subr.bf16.mxu1 %v528_v0 }
  0x3c   :  { %383 = vmatpush3.bf16.msra.mxu0 %v425_v9  ;;  %403 = vmatpush3.bf16.msra.mxu1 %v434_v15 }
  0x3d   :  { %384 = vmatprep.subr.bf16.mxu0 %v528_v0  ;;  %404 = vmatprep.subr.bf16.mxu1 %v528_v0 }
  0x40   :  { %385 = vmatpush3.bf16.msra.mxu0 %v426_v11  ;;  %405 = vmatpush3.bf16.msra.mxu1 %v435_v16 }
  0x41   :  { %386 = vmatprep.subr.bf16.mxu0 %v528_v0  ;;  %406 = vmatprep.subr.bf16.mxu1 %v528_v0 }
  0x44   :  { %387 = vmatpush3.bf16.msra.mxu0 %v427_v13  ;;  %407 = vmatpush3.bf16.msra.mxu1 %v436_v17 }
  0x47   :  { %389 = vmatmul.mubr.bf16.vlgmr.msra.gmra.mxu0 %v428_v14 }
 0x107   :  { %v176_v19 = vpop.f32.mrf.mxu0 }
 0x108   :  { %v177_v21 = vadd.f32 %v326_v18, %v176_v19 }
 0x109   :  { %v390_v20 = vpop.f32.mrf.mxu0 }
 0x10a   :  { %v183_v25 = vmax.f32 %v177_v21, 0.0 }
 0x10b   :  { %v179_v22 = vpop.f32.mrf.mxu0 }
 0x10c   :  { %v180_v23 = vadd.f32 %v326_v18, %v179_v22 }
 0x10d   :  { %v391_v24 = vpop.f32.mrf.mxu0 }
 0x10e   :  { %v184_v26 = vmax.f32 %v180_v23, 0.0 }
 0x110   :  { %v185_v27 = vpack.c.bf16 %v184_v26, %v183_v25 }
 0x112   :  { %409 = vmatmul.mubr.bf16.vlgmr.msra.gmra.mxu1 %v185_v27 }
 0x1d2   :  { %v291_v28 = vpop.f32.mrf.mxu1 }
 0x1d3   :  { %v292_v32 = vadd.f32 %v336_v29, %v291_v28 }
 0x1d4   :  { %v410_v30 = vpop.f32.mrf.mxu1 }
 0x1d6   :  { %v294_v31 = vpop.f32.mrf.mxu1 }
 0x1d7   :  { %v295_v33 = vadd.f32 %v336_v29, %v294_v31 }
 0x1d8   :  { %v411_v34 = vpop.f32.mrf.mxu1 }
 0x1d9   :  { %v352_v35 = vpack.c.bf16 %v295_v33, %v292_v32 }
 0x1db   :  { %353 = vst [vmem:[#allocation8] sm:$0xff] %v352_v35  }
 0x1dc   :  { %508 = shalt.err (!%p505_p5)
}
 0x1dd   :  { %319 = dma.vmem_to_hbm [thread:$0]  %s314_s12, 128, %s596_s5, [#allocation4], %s525_s23, %s525_s23, %s526_s24  }
 0x1de   :  { %521 = dma.done.wait [#allocation4], 128  }
 0x1df   :  { %522 = vsyncadd [#allocation4], 4294967168 }
 0x1e0   :  { %323 = vsyncpa [#allocation3], 1 }
 0x1e1   :  { %324 = vsyncpa [#allocation6], 1 }
 0x1e2   :  { %325 = vsyncpa [#allocation4], 1 }

// kernel: tpu_custom_call.1
= control target key start
LH: loop header
LB: loop body
LE: loop exit
PB: predicated region body
PF: predicated region fallthrough
CT: control target
= control target key end

     0   :  { %10 = vsyncpa [#allocation3], 0  ;;  %s591_s0 = inlined_call_operand.hbm [shape: bf16[16,128], index: 0, kind: input, shape index: {}]   ;;  %s592_s1 = inlined_call_operand.hbm [shape: bf16[128,128], index: 1, kind: input, shape index: {}]   ;;  %s593_s2 = inlined_call_operand.vmem [shape: f32[1,128], index: 2, kind: input, shape index: {}]   ;;  %s594_s3 = inlined_call_operand.hbm [shape: bf16[128,128], index: 3, kind: input, shape index: {}]   ;;  %s595_s4 = inlined_call_operand.vmem [shape: f32[1,128], index: 4, kind: input, shape index: {}]   ;;  %s596_s5 = inlined_call_operand.hbm [shape: bf16[16,128], index: 5, kind: output, shape index: {}]  }
   0x1   :  { %11 = vsyncpa [#allocation6], 0 }
   0x2   :  { %12 = vsyncpa [#allocation4], 0  ;;  %s523_s18 = smov [#allocation5]   ;;  %s524_s20 = smov [#allocation2]  }
   0x3   :  { %s30_s19 = sshll.u32 %s523_s18, 4  ;;  %s18_s21 = sshll.u32 %s524_s20, 4  ;;  %s31_s19 = int_to_ptr.vmem [resolvable:$true] %s30_s19  ;;  %s19_s21 = int_to_ptr.vmem [resolvable:$true] %s18_s21 }
   0x4   :  { %s445_s22 = scalar_lea.vmem %s31_s19, 1024  ;;  %p450_p1 = scmp.lt.s32.totalorder %s31_s19, %s31_s19 }
   0x5   :  { %p446_p0 = scmp.ne.s32.totalorder %s31_s19, %s445_s22  ;;  %p451_p2 = scmp.lt.s32.totalorder %s445_s22, %s445_s22 }
   0x7   :  { %p452_p3 = por %p451_p2, %p450_p1 }
   0x9   :  { %p453_p4 = pnand %p452_p3, %p446_p0 }
   0xb   :  { %456 = shalt.err (!%p453_p4)
}
   0xc   :  { %s525_s23 = smov 64   ;;  %s526_s24 = smov 4  }
   0xd   :  { %36 = dma.hbm_to_vmem [thread:$0]  %s592_s1, 1024, %s31_s19, [#allocation6], %s525_s23, %s525_s23, %s526_s24  }
   0xe   :  { %s465_s27 = scalar_lea.vmem %s19_s21, 128  ;;  %p470_p6 = scmp.lt.s32.totalorder %s19_s21, %s19_s21 }
   0xf   :  { %p466_p5 = scmp.ne.s32.totalorder %s19_s21, %s465_s27  ;;  %p471_p7 = scmp.lt.s32.totalorder %s465_s27, %s465_s27 }
  0x11   :  { %p472_p8 = por %p471_p7, %p470_p6 }
  0x13   :  { %p473_p9 = pnand %p472_p8, %p466_p5 }
  0x15   :  { %476 = shalt.err (!%p473_p9)
}
  0x16   :  { %24 = dma.hbm_to_vmem [thread:$0]  %s591_s0, 128, %s19_s21, [#allocation3], %s525_s23, %s525_s23, %s526_s24  }
  0x17   :  { %s527_s30 = smov [#allocation7]  }
  0x18   :  { %s44_s6 = sshll.u32 %s527_s30, 4  ;;  %s45_s6 = int_to_ptr.vmem [resolvable:$true] %s44_s6 }
  0x19   :  { %s485_s7 = scalar_lea.vmem %s45_s6, 1024  ;;  %p490_p11 = scmp.lt.s32.totalorder %s45_s6, %s45_s6 }
  0x1a   :  { %p486_p10 = scmp.ne.s32.totalorder %s45_s6, %s485_s7  ;;  %p491_p12 = scmp.lt.s32.totalorder %s485_s7, %s485_s7 }
  0x1c   :  { %p492_p13 = por %p491_p12, %p490_p11 }
  0x1e   :  { %p493_p0 = pnand %p492_p13, %p486_p10 }
  0x20   :  { %496 = shalt.err (!%p493_p0)
}
  0x21   :  { %50 = dma.hbm_to_vmem [thread:$0]  %s594_s3, 1024, %s45_s6, [#allocation6], %s525_s23, %s525_s23, %s526_s24  }
  0x22   :  { %517 = dma.done.wait [#allocation3], 128  }
  0x23   :  { %518 = vsyncadd [#allocation3], 4294967168 }
  0x24   :  { %519 = dma.done.wait [#allocation6], 2048  }
  0x25   :  { %520 = vsyncadd [#allocation6], 4294965248  ;;  %v528_v0 = vmov 0.0   ;;  %vm529_vm0 = vmmov 0   ;;  %v420_v1 = vld [vmem:[#allocation5 + $0x38] sm:$0xff]   ;;  %v421_v2 = vld [vmem:[#allocation5 + $0x30] sm:$0xff]  }
  0x26   :  { %372 = vmatprep.subr.bf16.mxu0 %v528_v0  ;;  %388 = vmatprep.mubr.msk.bf16.mxu0 %vm529_vm0, %v528_v0  ;;  %v422_v3 = vld [vmem:[#allocation5 + $0x28] sm:$0xff]   ;;  %v429_v4 = vld [vmem:[#allocation7 + $0x38] sm:$0xff]   ;;  %v423_v5 = vld [vmem:[#allocation5 + $0x20] sm:$0xff]   ;;  %s530_s11 = smov [#allocation8]  }
  0x27   :  { %392 = vmatprep.subr.bf16.mxu1 %v528_v0  ;;  %408 = vmatprep.mubr.msk.bf16.mxu1 %vm529_vm0, %v528_v0  ;;  %v430_v6 = vld [vmem:[#allocation7 + $0x30] sm:$0xff]   ;;  %v424_v7 = vld [vmem:[#allocation5 + $0x18] sm:$0xff]   ;;  %v431_v8 = vld [vmem:[#allocation7 + $0x28] sm:$0xff]   ;;  %s313_s12 = sshll.u32 %s530_s11, 4  ;;  %s314_s12 = int_to_ptr.vmem [resolvable:$true] %s313_s12 }
  0x28   :  { %373 = vmatpush3.bf16.msra.mxu0 %v420_v1  ;;  %393 = vmatpush3.bf16.msra.mxu1 %v429_v4  ;;  %v425_v9 = vld [vmem:[#allocation5 + $0x10] sm:$0xff]   ;;  %v432_v10 = vld [vmem:[#allocation7 + $0x20] sm:$0xff]   ;;  %v426_v11 = vld [vmem:[#allocation5 + $0x8] sm:$0xff]   ;;  %p502_p2 = scmp.lt.s32.totalorder %s314_s12, %s314_s12 }
  0x29   :  { %374 = vmatprep.subr.bf16.mxu0 %v528_v0  ;;  %394 = vmatprep.subr.bf16.mxu1 %v528_v0  ;;  %v433_v12 = vld [vmem:[#allocation7 + $0x18] sm:$0xff]   ;;  %v427_v13 = vld [vmem:[#allocation5] sm:$0xff]   ;;  %v434_v15 = vld [vmem:[#allocation7 + $0x10] sm:$0xff]  }
  0x2a   :  { %v428_v14 = vld [vmem:[#allocation2] sm:$0xff]   ;;  %v435_v16 = vld [vmem:[#allocation7 + $0x8] sm:$0xff]   ;;  %v436_v17 = vld [vmem:[#allocation7] sm:$0xff]  }
  0x2b   :  { %v326_v18 = vld [vmem:[%s593_s2] ss:$0 sm:$0xff]  ;;  %s497_s2 = scalar_lea.vmem %s314_s12, 128 }
  0x2c   :  { %375 = vmatpush3.bf16.msra.mxu0 %v421_v2  ;;  %395 = vmatpush3.bf16.msra.mxu1 %v430_v6  ;;  %v336_v29 = vld [vmem:[%s595_s4] ss:$0 sm:$0xff]  ;;  %p498_p1 = scmp.ne.s32.totalorder %s314_s12, %s497_s2  ;;  %p503_p3 = scmp.lt.s32.totalorder %s497_s2, %s497_s2 }
  0x2d   :  { %376 = vmatprep.subr.bf16.mxu0 %v528_v0  ;;  %396 = vmatprep.subr.bf16.mxu1 %v528_v0 }
  0x2e   :  { %p504_p4 = por %p503_p3, %p502_p2 }
  0x30   :  { %377 = vmatpush3.bf16.msra.mxu0 %v422_v3  ;;  %397 = vmatpush3.bf16.msra.mxu1 %v431_v8  ;;  %p505_p5 = pnand %p504_p4, %p498_p1 }
  0x31   :  { %378 = vmatprep.subr.bf16.mxu0 %v528_v0  ;;  %398 = vmatprep.subr.bf16.mxu1 %v528_v0 }
  0x34   :  { %379 = vmatpush3.bf16.msra.mxu0 %v423_v5  ;;  %399 = vmatpush3.bf16.msra.mxu1 %v432_v10 }
  0x35   :  { %380 = vmatprep.subr.bf16.mxu0 %v528_v0  ;;  %400 = vmatprep.subr.bf16.mxu1 %v528_v0 }
  0x38   :  { %381 = vmatpush3.bf16.msra.mxu0 %v424_v7  ;;  %401 = vmatpush3.bf16.msra.mxu1 %v433_v12 }
  0x39   :  { %382 = vmatprep.subr.bf16.mxu0 %v528_v0  ;;  %402 = vmatprep.subr.bf16.mxu1 %v528_v0 }
  0x3c   :  { %383 = vmatpush3.bf16.msra.mxu0 %v425_v9  ;;  %403 = vmatpush3.bf16.msra.mxu1 %v434_v15 }
  0x3d   :  { %384 = vmatprep.subr.bf16.mxu0 %v528_v0  ;;  %404 = vmatprep.subr.bf16.mxu1 %v528_v0 }
  0x40   :  { %385 = vmatpush3.bf16.msra.mxu0 %v426_v11  ;;  %405 = vmatpush3.bf16.msra.mxu1 %v435_v16 }
  0x41   :  { %386 = vmatprep.subr.bf16.mxu0 %v528_v0  ;;  %406 = vmatprep.subr.bf16.mxu1 %v528_v0 }
  0x44   :  { %387 = vmatpush3.bf16.msra.mxu0 %v427_v13  ;;  %407 = vmatpush3.bf16.msra.mxu1 %v436_v17 }
  0x47   :  { %389 = vmatmul.mubr.bf16.vlgmr.msra.gmra.mxu0 %v428_v14 }
 0x107   :  { %v176_v19 = vpop.f32.mrf.mxu0 }
 0x108   :  { %v177_v21 = vadd.f32 %v326_v18, %v176_v19 }
 0x109   :  { %v390_v20 = vpop.f32.mrf.mxu0 }
 0x10a   :  { %v183_v25 = vmax.f32 %v177_v21, 0.0 }
 0x10b   :  { %v179_v22 = vpop.f32.mrf.mxu0 }
 0x10c   :  { %v180_v23 = vadd.f32 %v326_v18, %v179_v22 }
 0x10d   :  { %v391_v24 = vpop.f32.mrf.mxu0 }
 0x10e   :  { %v184_v26 = vmax.f32 %v180_v23, 0.0 }
 0x110   :  { %v185_v27 = vpack.c.bf16 %v184_v26, %v183_v25 }
 0x112   :  { %409 = vmatmul.mubr.bf16.vlgmr.msra.gmra.mxu1 %v185_v27 }
 0x1d2   :  { %v291_v28 = vpop.f32.mrf.mxu1 }
 0x1d3   :  { %v292_v32 = vadd.f32 %v336_v29, %v291_v28 }
 0x1d4   :  { %v410_v30 = vpop.f32.mrf.mxu1 }
 0x1d6   :  { %v294_v31 = vpop.f32.mrf.mxu1 }
 0x1d7   :  { %v295_v33 = vadd.f32 %v336_v29, %v294_v31 }
 0x1d8   :  { %v411_v34 = vpop.f32.mrf.mxu1 }
 0x1d9   :  { %v352_v35 = vpack.c.bf16 %v295_v33, %v292_v32 }
 0x1db   :  { %353 = vst [vmem:[#allocation8] sm:$0xff] %v352_v35  }
 0x1dc   :  { %508 = shalt.err (!%p505_p5)
}
 0x1dd   :  { %319 = dma.vmem_to_hbm [thread:$0]  %s314_s12, 128, %s596_s5, [#allocation4], %s525_s23, %s525_s23, %s526_s24  }
 0x1de   :  { %521 = dma.done.wait [#allocation4], 128  }
 0x1df   :  { %522 = vsyncadd [#allocation4], 4294967168 }
 0x1e0   :  { %323 = vsyncpa [#allocation3], 1 }
 0x1e1   :  { %324 = vsyncpa [#allocation6], 1 }
 0x1e2   :  { %325 = vsyncpa [#allocation4], 1 }

</bundles_post_ra>
